<compile_context>
chip_gen: v6e
topology: v6e:2x2x1
jax: 0.10.0
libtpu: 0.0.40
codegen_flags: <defaults>
</compile_context>

<pallas_src>
import jax
import jax.numpy as jnp
import numpy as np
from jax.experimental import pallas as pl
from jax.experimental.pallas import tpu as pltpu

LANE = 128


def _round_up(n, m):
    return ((n + m - 1) // m) * m


def gcn_layer_kernel(adj_ref, x_ref, w1_ref, b1_ref, w2_ref, b2_ref, out_ref):
    """One grid step == one block of batch elements.

    adj_ref : (BB, S, S)  bf16 normalized adjacency A_hat[target, source]
    x_ref   : (BB, S, Dp) bf16 node features (Din zero-padded to Dp=128k)
    w1_ref  : (Dp, Hp) bf16,  b1_ref: (1, Hp) f32
    w2_ref  : (Hp, Op) bf16,  b2_ref: (1, Op) f32
    out_ref : (BB, S, Op) f32
    """
    bb, s, dp = x_ref.shape
    hp = w1_ref.shape[1]
    op = w2_ref.shape[1]

    adj = adj_ref[...]                                   # (BB, S, S)  bf16
    x2d = x_ref[...].reshape(bb * s, dp)                 # (BB*S, Dp)  bf16

    # ---- GCNConv #1: relu(A_hat @ (X W1) + b1) ----
    xw = jnp.dot(x2d, w1_ref[...], preferred_element_type=jnp.float32)
    xw = xw.reshape(bb, s, hp).astype(jnp.bfloat16)
    h1 = jnp.einsum('bts,bsh->bth', adj, xw,
                    preferred_element_type=jnp.float32)  # (BB, S, Hp) f32
    h1 = jnp.maximum(h1 + b1_ref[...], 0.0)
    # TODO(synk): F.dropout with training=True (stochastic) not implemented;
    # eval-mode dropout is identity, matching module.eval().

    # ---- GCNConv #2: relu(A_hat @ (H1 W2) + b2) ----
    h1b = h1.astype(jnp.bfloat16).reshape(bb * s, hp)
    hw = jnp.dot(h1b, w2_ref[...], preferred_element_type=jnp.float32)
    hw = hw.reshape(bb, s, op).astype(jnp.bfloat16)
    h2 = jnp.einsum('bts,bsh->bth', adj, hw,
                    preferred_element_type=jnp.float32)  # (BB, S, Op) f32
    h2 = jnp.maximum(h2 + b2_ref[...], 0.0)

    out_ref[...] = h2.astype(out_ref.dtype)


def build_normalized_adjacency(edge_index, seq_len):
    """edge_index: int array [2, E] (row 0 = source, row 1 = target).
    Returns dense A_hat[target, source] = d^{-1/2}[t] * d^{-1/2}[s] for
    (A + I), matching PyG gcn_norm with edge_weight=1 (duplicate edges
    accumulate, like scatter_add)."""
    src = edge_index[0]
    tgt = edge_index[1]
    a = jnp.zeros((seq_len, seq_len), jnp.float32)
    a = a.at[tgt, src].add(1.0)                      # A[t, s], duplicates add
    a = a + jnp.eye(seq_len, dtype=jnp.float32)      # self loops
    deg = a.sum(axis=1)                              # in-degree incl. self loop
    dinv = jnp.where(deg > 0, 1.0 / jnp.sqrt(deg), 0.0)
    return dinv[:, None] * a * dinv[None, :]


def gcn_layer_forward(edge_indices, x, w1, b1, w2, b2, *, batch_block=None):
    """edge_indices: list of [2, E] int arrays (len == bsz, equal E)
    x: [seq_len, bsz, embed_dim] float32
    returns: [seq_len, bsz, embed_dim] float32"""
    seq_len, bsz, embed_dim = x.shape
    din, hid = w1.shape
    hid2, dout = w2.shape
    assert din == embed_dim and dout == embed_dim and hid2 == hid
    assert len(edge_indices) == bsz

    # batch block per grid step; default = whole batch in one step (toy sizes).
    bb = bsz if batch_block is None else min(batch_block, bsz)
    assert bsz % bb == 0
    grid = (bsz // bb,)

    # lane-dense padded feature widths
    dp = _round_up(din, LANE)
    hp = _round_up(hid, LANE)
    op = _round_up(dout, LANE)

    # glue: vmapped dense normalized adjacency, emitted in bf16
    edge_stack = jnp.stack([jnp.asarray(g, jnp.int32) for g in edge_indices])
    adj = jax.vmap(lambda ei: build_normalized_adjacency(ei, seq_len))(edge_stack)
    adj = adj.astype(jnp.bfloat16)                                   # (B, S, S)

    # glue: batch-major, zero-padded, bf16 node features
    x_b = jnp.transpose(x, (1, 0, 2)).astype(jnp.float32)            # (B, S, Din)
    x_b = jnp.pad(x_b, ((0, 0), (0, 0), (0, dp - din))).astype(jnp.bfloat16)

    # zero-padded weights (bf16 for MXU) and full-width f32 bias rows
    w1_p = jnp.pad(w1.astype(jnp.float32),
                   ((0, dp - din), (0, hp - hid))).astype(jnp.bfloat16)
    w2_p = jnp.pad(w2.astype(jnp.float32),
                   ((0, hp - hid), (0, op - dout))).astype(jnp.bfloat16)
    b1_p = jnp.pad(b1.astype(jnp.float32), (0, hp - hid)).reshape(1, hp)
    b2_p = jnp.pad(b2.astype(jnp.float32), (0, op - dout)).reshape(1, op)

    out = pl.pallas_call(
        gcn_layer_kernel,
        out_shape=jax.ShapeDtypeStruct((bsz, seq_len, op), jnp.float32),
        grid_spec=pltpu.PrefetchScalarGridSpec(
            num_scalar_prefetch=0,
            grid=grid,
            in_specs=[
                pl.BlockSpec((bb, seq_len, seq_len), lambda i: (i, 0, 0)),  # adj
                pl.BlockSpec((bb, seq_len, dp), lambda i: (i, 0, 0)),       # x
                pl.BlockSpec((dp, hp), lambda i: (0, 0)),                   # w1
                pl.BlockSpec((1, hp), lambda i: (0, 0)),                    # b1
                pl.BlockSpec((hp, op), lambda i: (0, 0)),                   # w2
                pl.BlockSpec((1, op), lambda i: (0, 0)),                    # b2
            ],
            out_specs=pl.BlockSpec((bb, seq_len, op), lambda i: (i, 0, 0)),
        ),
        compiler_params=pltpu.CompilerParams(
            dimension_semantics=("parallel",)),
    )(adj, x_b, w1_p, b1_p, w2_p, b2_p)

    # drop lane padding, back to [seq_len, bsz, embed_dim]
    return jnp.transpose(out[:, :, :dout], (1, 0, 2))


def glorot(key, shape):
    fan_in, fan_out = shape
    limit = float(np.sqrt(6.0 / (fan_in + fan_out)))
    return jax.random.uniform(key, shape, jnp.float32, -limit, limit)


if __name__ == "__main__":
    # small shapes consistent with the module:
    # args.gnn_layers=2, former_encoder_dim=latter_encoder_dim=embed_dim=32,
    # gnn_hidden_states=16
    seq_len, bsz, embed_dim, hidden = 8, 2, 32, 16

    key = jax.random.PRNGKey(0)
    kx, kw1, kw2 = jax.random.split(key, 3)

    x = jax.random.normal(kx, (seq_len, bsz, embed_dim), jnp.float32)

    # deterministic parameters (PyG GCNConv: glorot weight, zero bias)
    w1 = glorot(kw1, (embed_dim, hidden))
    b1 = jnp.zeros((hidden,), jnp.float32)
    w2 = glorot(kw2, (hidden, embed_dim))
    b2 = jnp.zeros((embed_dim,), jnp.float32)

    # deterministic per-batch graphs: undirected chain in COO format [2, E]
    def chain_graph(n):
        src = list(range(n - 1)) + list(range(1, n))
        tgt = list(range(1, n)) + list(range(n - 1))
        return jnp.array([src, tgt], dtype=jnp.int32)

    graphs = [chain_graph(seq_len) for _ in range(bsz)]

    out = jax.jit(gcn_layer_forward)(graphs, x, w1, b1, w2, b2)
    jax.block_until_ready(out)
    assert out.shape == (seq_len, bsz, embed_dim)

    # pure-JAX f32 reference (loose tolerance: kernel feeds bf16 to the MXU)
    adj_f32 = jax.vmap(lambda ei: build_normalized_adjacency(ei, seq_len))(
        jnp.stack(graphs))
    xb = jnp.transpose(x, (1, 0, 2))
    h = jnp.maximum(jnp.einsum('bts,bsh->bth', adj_f32, xb @ w1) + b1, 0.0)
    h = jnp.maximum(jnp.einsum('bts,bsh->bth', adj_f32, h @ w2) + b2, 0.0)
    ref = jnp.transpose(h, (1, 0, 2))
    assert jnp.allclose(out, ref, atol=1e-1, rtol=1e-1), \
        float(jnp.max(jnp.abs(out - ref)))

    print("KERNEL_OK")
</pallas_src>

<mosaic_0001>
module attributes {stable_mosaic.version = 11 : i64} {
  func.func @gcn_layer_kernel(%arg0: i32, %arg1: memref<2x8x8xbf16, #tpu.memory_space<vmem>>, %arg2: memref<2x8x128xbf16, #tpu.memory_space<vmem>>, %arg3: memref<128x128xbf16, #tpu.memory_space<vmem>>, %arg4: memref<1x128xf32, #tpu.memory_space<vmem>>, %arg5: memref<128x128xbf16, #tpu.memory_space<vmem>>, %arg6: memref<1x128xf32, #tpu.memory_space<vmem>>, %arg7: memref<2x8x128xf32, #tpu.memory_space<vmem>>) attributes {dimension_semantics = [#tpu.dimension_semantics<parallel>], iteration_bounds = array<i64: 1>, scalar_prefetch = 0 : i64, scratch_operands = 0 : i64, tpu.core_type = #tpu.core_type<tc>, window_params = [{transform_indices = @transform_0, window_bounds = array<i64: 2, 8, 8>}, {transform_indices = @transform_1, window_bounds = array<i64: 2, 8, 128>}, {pipeline_mode = #tpu.pipeline_mode<synchronous>, transform_indices = @transform_2, window_bounds = array<i64: 128, 128>}, {pipeline_mode = #tpu.pipeline_mode<synchronous>, transform_indices = @transform_3, window_bounds = array<i64: 1, 128>}, {pipeline_mode = #tpu.pipeline_mode<synchronous>, transform_indices = @transform_4, window_bounds = array<i64: 128, 128>}, {pipeline_mode = #tpu.pipeline_mode<synchronous>, transform_indices = @transform_5, window_bounds = array<i64: 1, 128>}, {transform_indices = @transform_6, window_bounds = array<i64: 2, 8, 128>}]} {
    %c0 = arith.constant 0 : index
    %c0_0 = arith.constant 0 : index
    %c0_1 = arith.constant 0 : index
    %0 = vector.load %arg1[%c0, %c0_0, %c0_1] : memref<2x8x8xbf16, #tpu.memory_space<vmem>>, vector<2x8x8xbf16>
    %c0_2 = arith.constant 0 : index
    %c0_3 = arith.constant 0 : index
    %c0_4 = arith.constant 0 : index
    %1 = vector.load %arg2[%c0_2, %c0_3, %c0_4] : memref<2x8x128xbf16, #tpu.memory_space<vmem>>, vector<2x8x128xbf16>
    %2 = vector.shape_cast %1 : vector<2x8x128xbf16> to vector<16x128xbf16>
    %c0_5 = arith.constant 0 : index
    %c0_6 = arith.constant 0 : index
    %3 = vector.load %arg3[%c0_5, %c0_6] : memref<128x128xbf16, #tpu.memory_space<vmem>>, vector<128x128xbf16>
    %cst = arith.constant dense<0.000000e+00> : vector<16x128xf32>
    %4 = tpu.matmul %2, %3, %cst {dimension_numbers = #tpu.dot_dimension_numbers<[1], [0], [0], [1], [0, 0, 1, 1], [], []>} : vector<16x128xbf16>, vector<128x128xbf16>, vector<16x128xf32> -> vector<16x128xf32>
    %5 = vector.shape_cast %4 : vector<16x128xf32> to vector<2x8x128xf32>
    %6 = arith.truncf %5 : vector<2x8x128xf32> to vector<2x8x128xbf16>
    "tpu.trace_start"() <{level = 10 : i32, message = "bts,bsh->bth"}> : () -> ()
    %cst_7 = arith.constant dense<0.000000e+00> : vector<2x8x128xf32>
    %7 = tpu.matmul %0, %6, %cst_7 {dimension_numbers = #tpu.dot_dimension_numbers<[2], [1], [1], [2], [0, 0, 0, 1, 1, 2], [0], [0]>} : vector<2x8x8xbf16>, vector<2x8x128xbf16>, vector<2x8x128xf32> -> vector<2x8x128xf32>
    "tpu.trace_stop"() : () -> ()
    %c0_8 = arith.constant 0 : index
    %c0_9 = arith.constant 0 : index
    %8 = vector.load %arg4[%c0_8, %c0_9] : memref<1x128xf32, #tpu.memory_space<vmem>>, vector<1x128xf32>
    %9 = vector.shape_cast %8 : vector<1x128xf32> to vector<1x1x128xf32>
    %10 = vector.broadcast %9 : vector<1x1x128xf32> to vector<2x8x128xf32>
    %11 = arith.addf %7, %10 : vector<2x8x128xf32>
    %cst_10 = arith.constant 0.000000e+00 : f32
    %12 = vector.broadcast %cst_10 : f32 to vector<2x8x128xf32>
    %13 = arith.maximumf %11, %12 : vector<2x8x128xf32>
    %14 = arith.truncf %13 : vector<2x8x128xf32> to vector<2x8x128xbf16>
    %15 = vector.shape_cast %14 : vector<2x8x128xbf16> to vector<16x128xbf16>
    %c0_11 = arith.constant 0 : index
    %c0_12 = arith.constant 0 : index
    %16 = vector.load %arg5[%c0_11, %c0_12] : memref<128x128xbf16, #tpu.memory_space<vmem>>, vector<128x128xbf16>
    %cst_13 = arith.constant dense<0.000000e+00> : vector<16x128xf32>
    %17 = tpu.matmul %15, %16, %cst_13 {dimension_numbers = #tpu.dot_dimension_numbers<[1], [0], [0], [1], [0, 0, 1, 1], [], []>} : vector<16x128xbf16>, vector<128x128xbf16>, vector<16x128xf32> -> vector<16x128xf32>
    %18 = vector.shape_cast %17 : vector<16x128xf32> to vector<2x8x128xf32>
    %19 = arith.truncf %18 : vector<2x8x128xf32> to vector<2x8x128xbf16>
    "tpu.trace_start"() <{level = 10 : i32, message = "bts,bsh->bth"}> : () -> ()
    %cst_14 = arith.constant dense<0.000000e+00> : vector<2x8x128xf32>
    %20 = tpu.matmul %0, %19, %cst_14 {dimension_numbers = #tpu.dot_dimension_numbers<[2], [1], [1], [2], [0, 0, 0, 1, 1, 2], [0], [0]>} : vector<2x8x8xbf16>, vector<2x8x128xbf16>, vector<2x8x128xf32> -> vector<2x8x128xf32>
    "tpu.trace_stop"() : () -> ()
    %c0_15 = arith.constant 0 : index
    %c0_16 = arith.constant 0 : index
    %21 = vector.load %arg6[%c0_15, %c0_16] : memref<1x128xf32, #tpu.memory_space<vmem>>, vector<1x128xf32>
    %22 = vector.shape_cast %21 : vector<1x128xf32> to vector<1x1x128xf32>
    %23 = vector.broadcast %22 : vector<1x1x128xf32> to vector<2x8x128xf32>
    %24 = arith.addf %20, %23 : vector<2x8x128xf32>
    %cst_17 = arith.constant 0.000000e+00 : f32
    %25 = vector.broadcast %cst_17 : f32 to vector<2x8x128xf32>
    %26 = arith.maximumf %24, %25 : vector<2x8x128xf32>
    %c0_18 = arith.constant 0 : index
    %c0_19 = arith.constant 0 : index
    %c0_20 = arith.constant 0 : index
    %27 = vector.load %arg7[%c0_18, %c0_19, %c0_20] : memref<2x8x128xf32, #tpu.memory_space<vmem>>, vector<2x8x128xf32>
    tpu.vector_store %arg7[%c0_18, %c0_19, %c0_20], %26 {strides = array<i32>} : memref<2x8x128xf32, #tpu.memory_space<vmem>>, vector<2x8x128xf32>,
    return
  }
  func.func @transform_0(%arg0: i32) -> (i32, i32, i32) {
    %c0_i32 = arith.constant 0 : i32
    %c0_i32_0 = arith.constant 0 : i32
    %c0_i32_1 = arith.constant 0 : i32
    return %arg0, %c0_i32, %c0_i32_0 : i32, i32, i32
  }
  func.func @transform_1(%arg0: i32) -> (i32, i32, i32) {
    %c0_i32 = arith.constant 0 : i32
    %c0_i32_0 = arith.constant 0 : i32
    %c0_i32_1 = arith.constant 0 : i32
    return %arg0, %c0_i32, %c0_i32_0 : i32, i32, i32
  }
  func.func @transform_2(%arg0: i32) -> (i32, i32) {
    %c0_i32 = arith.constant 0 : i32
    %c0_i32_0 = arith.constant 0 : i32
    %c0_i32_1 = arith.constant 0 : i32
    return %c0_i32, %c0_i32_0 : i32, i32
  }
  func.func @transform_3(%arg0: i32) -> (i32, i32) {
    %c0_i32 = arith.constant 0 : i32
    %c0_i32_0 = arith.constant 0 : i32
    %c0_i32_1 = arith.constant 0 : i32
    return %c0_i32, %c0_i32_0 : i32, i32
  }
  func.func @transform_4(%arg0: i32) -> (i32, i32) {
    %c0_i32 = arith.constant 0 : i32
    %c0_i32_0 = arith.constant 0 : i32
    %c0_i32_1 = arith.constant 0 : i32
    return %c0_i32, %c0_i32_0 : i32, i32
  }
  func.func @transform_5(%arg0: i32) -> (i32, i32) {
    %c0_i32 = arith.constant 0 : i32
    %c0_i32_0 = arith.constant 0 : i32
    %c0_i32_1 = arith.constant 0 : i32
    return %c0_i32, %c0_i32_0 : i32, i32
  }
  func.func @transform_6(%arg0: i32) -> (i32, i32, i32) {
    %c0_i32 = arith.constant 0 : i32
    %c0_i32_0 = arith.constant 0 : i32
    %c0_i32_1 = arith.constant 0 : i32
    return %arg0, %c0_i32, %c0_i32_0 : i32, i32, i32
  }
}

</mosaic_0001>

<bundles_post_ra>
// kernel: gcn_layer_forward.1
= control target key start
LH: loop header
LB: loop body
LE: loop exit
PB: predicated region body
PF: predicated region fallthrough
CT: control target
= control target key end

     0   :  { %v594_v0 = vmov 0.0   ;;  %vm595_vm0 = vmmov 0   ;;  %vm152_vm1 = vcmask 1043456   ;;  %vm148_vm2 = vcmask 64512   ;;  %s740_s2 = inlined_call_operand.vmem [shape: bf16[128,128], index: 2, kind: input, shape index: {}]   ;;  %s741_s1 = inlined_call_operand.vmem [shape: bf16[2,8,128], index: 1, kind: input, shape index: {}]   ;;  %s742_s4 = inlined_call_operand.vmem [shape: bf16[128,128], index: 4, kind: input, shape index: {}]   ;;  %s743_s0 = inlined_call_operand.vmem [shape: bf16[2,8,8], index: 0, kind: input, shape index: {}]   ;;  %s744_s3 = inlined_call_operand.vmem [shape: f32[1,128], index: 3, kind: input, shape index: {}]   ;;  %s745_s5 = inlined_call_operand.vmem [shape: f32[1,128], index: 5, kind: input, shape index: {}]   ;;  %s746_s6 = inlined_call_operand.vmem [shape: f32[2,8,128], index: 6, kind: output, shape index: {}]  }
   0x1   :  { %511 = vmatprep.subr.bf16.mxu0 %v594_v0  ;;  %v577_v1 = vld [vmem:[%s740_s2 + $0x38] sm:$0xff]   ;;  %527 = vmatprep.mubr.msk.bf16.mxu0 %vm595_vm0, %v594_v0  ;;  %v578_v2 = vld [vmem:[%s740_s2 + $0x30] sm:$0xff]   ;;  %v579_v3 = vld [vmem:[%s740_s2 + $0x28] sm:$0xff]  }
   0x2   :  { %531 = vmatprep.subr.bf16.mxu1 %v594_v0  ;;  %533 = vmatprep.mubr.msk.bf16.mxu1 %vm595_vm0, %v594_v0  ;;  %v580_v4 = vld [vmem:[%s740_s2 + $0x20] sm:$0xff]   ;;  %v581_v5 = vld [vmem:[%s740_s2 + $0x18] sm:$0xff]   ;;  %v582_v6 = vld [vmem:[%s740_s2 + $0x10] sm:$0xff]  }
   0x3   :  { %512 = vmatpush3.bf16.msra.mxu0 %v577_v1  ;;  %v583_v7 = vld [vmem:[%s740_s2 + $0x8] sm:$0xff]   ;;  %v584_v8 = vld [vmem:[%s740_s2] sm:$0xff]   ;;  %v586_v20 = vld [vmem:[%s742_s4 + $0x38] sm:$0xff]  }
   0x4   :  { %513 = vmatprep.subr.bf16.mxu0 %v594_v0  ;;  %v585_v9 = vld [vmem:[%s741_s1] sm:$0xff]   ;;  %v587_v21 = vld [vmem:[%s742_s4 + $0x30] sm:$0xff]   ;;  %v588_v22 = vld [vmem:[%s742_s4 + $0x28] sm:$0xff]  }
   0x5   :  { %v24_v15 = vld [vmem:[%s743_s0] sm:$0xf]  ;;  %v25_v19 = vld [vmem:[%s743_s0 + $0x4] sm:$0xf]  ;;  %v590_v24 = vld [vmem:[%s742_s4 + $0x18] sm:$0xff]  }
   0x6   :  { %v589_v23 = vld [vmem:[%s742_s4 + $0x20] sm:$0xff]   ;;  %v591_v25 = vld [vmem:[%s742_s4 + $0x10] sm:$0xff]   ;;  %v592_v26 = vld [vmem:[%s742_s4 + $0x8] sm:$0xff]  }
   0x7   :  { %514 = vmatpush3.bf16.msra.mxu0 %v578_v2  ;;  %v593_v27 = vld [vmem:[%s742_s4] sm:$0xff]  }
   0x8   :  { %515 = vmatprep.subr.bf16.mxu0 %v594_v0  ;;  %v469_v30 = vld [vmem:[%s744_s3] ss:$0 sm:$0xff] }
   0x9   :  { %v481_v50 = vld [vmem:[%s745_s5] ss:$0 sm:$0xff] }
   0xb   :  { %516 = vmatpush3.bf16.msra.mxu0 %v579_v3 }
   0xc   :  { %517 = vmatprep.subr.bf16.mxu0 %v594_v0 }
   0xf   :  { %518 = vmatpush3.bf16.msra.mxu0 %v580_v4 }
  0x10   :  { %519 = vmatprep.subr.bf16.mxu0 %v594_v0 }
  0x13   :  { %520 = vmatpush3.bf16.msra.mxu0 %v581_v5 }
  0x14   :  { %521 = vmatprep.subr.bf16.mxu0 %v594_v0 }
  0x17   :  { %522 = vmatpush3.bf16.msra.mxu0 %v582_v6 }
  0x18   :  { %523 = vmatprep.subr.bf16.mxu0 %v594_v0 }
  0x1b   :  { %524 = vmatpush3.bf16.msra.mxu0 %v583_v7 }
  0x1c   :  { %525 = vmatprep.subr.bf16.mxu0 %v594_v0 }
  0x1f   :  { %526 = vmatpush3.bf16.msra.mxu0 %v584_v8 }
  0x20   :  { %563 = vmatprep.subr.bf16.mxu0 %v594_v0 }
  0x22   :  { %528 = vmatmul.mubr.bf16.vlgmr.msra.gmra.mxu0 %v585_v9 }
  0x23   :  { %565 = vmatprep.mubr.msk.bf16.mxu0 %vm595_vm0, %v594_v0 }
  0xe2   :  { %v132_v10 = vpop.f32.mrf.mxu0 }
  0xe3   :  { %v139_v11 = vpack.c.bf16 %v132_v10, %v132_v10 }
  0xe4   :  { %v529_v12 = vpop.f32.mrf.mxu0 }
  0xe5   :  { %v154_v13 = vsel %vm152_vm1, %v139_v11, 0 }
  0xe6   :  { %v135_v14 = vpop.f32.mrf.mxu0  ;;  %532 = vmatpush3.bf16.msra.mxu1 %v154_v13 }
  0xe7   :  { %v140_v16 = vpack.c.bf16 %v135_v14, %v135_v14  ;;  %537 = vmatprep.subr.bf16.mxu1 %v594_v0 }
  0xe8   :  { %v530_v17 = vpop.f32.mrf.mxu0 }
  0xe9   :  { %v200_v18 = vsel %vm152_vm1, %v140_v16, 0  ;;  %534 = vmatmul.mubr.msk.bf16.vlgmr.msra.gmra.mxu1 %vm148_vm2, %v24_v15 }
  0xea   :  { %538 = vmatpush3.bf16.msra.mxu1 %v200_v18  ;;  %539 = vmatprep.mubr.msk.bf16.mxu1 %vm595_vm0, %v594_v0 }
  0xeb   :  { %543 = vmatprep.subr.bf16.mxu1 %v594_v0 }
  0xf1   :  { %540 = vmatmul.mubr.msk.bf16.vlgmr.msra.gmra.mxu1 %vm148_vm2, %v25_v19 }
  0xf2   :  { %544 = vmatpush3.bf16.msra.mxu1 %v586_v20  ;;  %559 = vmatprep.mubr.msk.bf16.mxu1 %vm595_vm0, %v594_v0 }
  0xf3   :  { %545 = vmatprep.subr.bf16.mxu1 %v594_v0 }
  0xf6   :  { %546 = vmatpush3.bf16.msra.mxu1 %v587_v21 }
  0xf7   :  { %547 = vmatprep.subr.bf16.mxu1 %v594_v0 }
  0xfa   :  { %548 = vmatpush3.bf16.msra.mxu1 %v588_v22 }
  0xfb   :  { %549 = vmatprep.subr.bf16.mxu1 %v594_v0 }
  0xfe   :  { %550 = vmatpush3.bf16.msra.mxu1 %v589_v23 }
  0xff   :  { %551 = vmatprep.subr.bf16.mxu1 %v594_v0 }
 0x102   :  { %552 = vmatpush3.bf16.msra.mxu1 %v590_v24 }
 0x103   :  { %553 = vmatprep.subr.bf16.mxu1 %v594_v0 }
 0x106   :  { %554 = vmatpush3.bf16.msra.mxu1 %v591_v25 }
 0x107   :  { %555 = vmatprep.subr.bf16.mxu1 %v594_v0 }
 0x10a   :  { %556 = vmatpush3.bf16.msra.mxu1 %v592_v26 }
 0x10b   :  { %557 = vmatprep.subr.bf16.mxu1 %v594_v0 }
 0x10e   :  { %558 = vmatpush3.bf16.msra.mxu1 %v593_v27 }
 0x1a9   :  { %v190_v28 = vpop.f32.mrf.mxu1 }
 0x1aa   :  { %v191_v33 = vadd.f32 %v469_v30, %v190_v28 }
 0x1ab   :  { %v535_v29 = vpop.f32.mrf.mxu1 }
 0x1ac   :  { %v242_v37 = vmax.f32 %v191_v33, 0.0 }
 0x1ad   :  { %v193_v31 = vpop.f32.mrf.mxu1 }
 0x1af   :  { %v536_v32 = vpop.f32.mrf.mxu1 }
 0x1b1   :  { %v236_v34 = vpop.f32.mrf.mxu1 }
 0x1b2   :  { %v237_v35 = vadd.f32 %v469_v30, %v236_v34 }
 0x1b3   :  { %v541_v36 = vpop.f32.mrf.mxu1 }
 0x1b4   :  { %v243_v38 = vmax.f32 %v237_v35, 0.0 }
 0x1b5   :  { %v239_v39 = vpop.f32.mrf.mxu1 }
 0x1b6   :  { %v484_v40 = vpack.c.bf16 %v243_v38, %v242_v37 }
 0x1b7   :  { %v542_v41 = vpop.f32.mrf.mxu1 }
 0x1b8   :  { %560 = vmatmul.mubr.bf16.vlgmr.msra.gmra.mxu1 %v484_v40 }
 0x278   :  { %v350_v42 = vpop.f32.mrf.mxu1 }
 0x279   :  { %v357_v43 = vpack.c.bf16 %v350_v42, %v350_v42 }
 0x27a   :  { %v561_v44 = vpop.f32.mrf.mxu1 }
 0x27b   :  { %v367_v45 = vsel %vm152_vm1, %v357_v43, 0 }
 0x27c   :  { %v353_v46 = vpop.f32.mrf.mxu1  ;;  %564 = vmatpush3.bf16.msra.mxu0 %v367_v45 }
 0x27d   :  { %v358_v47 = vpack.c.bf16 %v353_v46, %v353_v46  ;;  %569 = vmatprep.subr.bf16.mxu0 %v594_v0 }
 0x27e   :  { %v562_v48 = vpop.f32.mrf.mxu1 }
 0x27f   :  { %v410_v49 = vsel %vm152_vm1, %v358_v47, 0  ;;  %566 = vmatmul.mubr.msk.bf16.vlgmr.msra.gmra.mxu0 %vm148_vm2, %v24_v15 }
 0x280   :  { %570 = vmatpush3.bf16.msra.mxu0 %v410_v49  ;;  %571 = vmatprep.mubr.msk.bf16.mxu0 %vm595_vm0, %v594_v0 }
 0x287   :  { %572 = vmatmul.mubr.msk.bf16.vlgmr.msra.gmra.mxu0 %vm148_vm2, %v25_v19 }
 0x33f   :  { %v403_v51 = vpop.f32.mrf.mxu0 }
 0x340   :  { %v404_v52 = vadd.f32 %v481_v50, %v403_v51 }
 0x341   :  { %v567_v53 = vpop.f32.mrf.mxu0 }
 0x342   :  { %v452_v54 = vmax.f32 %v404_v52, 0.0 }
 0x343   :  { %v406_v55 = vpop.f32.mrf.mxu0 }
 0x344   :  { %454 = vst [vmem:[%s746_s6] sm:$0xff] %v452_v54 }
 0x345   :  { %v568_v56 = vpop.f32.mrf.mxu0 }
 0x347   :  { %v446_v57 = vpop.f32.mrf.mxu0 }
 0x348   :  { %v447_v58 = vadd.f32 %v481_v50, %v446_v57 }
 0x349   :  { %v573_v59 = vpop.f32.mrf.mxu0 }
 0x34a   :  { %v453_v60 = vmax.f32 %v447_v58, 0.0 }
 0x34b   :  { %v449_v61 = vpop.f32.mrf.mxu0 }
 0x34c   :  { %455 = vst [vmem:[%s746_s6 + $0x8] sm:$0xff] %v453_v60 }
 0x34d   :  { %v574_v62 = vpop.f32.mrf.mxu0 }

</bundles_post_ra>
